<compile_context>
chip_gen: v5e
topology: v5e:2x2
jax: 0.10.0
libtpu: 0.0.40
codegen_flags: <defaults>
</compile_context>

<pallas_src>
import functools

import jax
import jax.numpy as jnp
from jax import lax
from jax.experimental import pallas as pl
from jax.experimental.pallas import tpu as pltpu


def _round_up(x, m):
    return ((x + m - 1) // m) * m


def _pick_c_tile(C, B):
    """Channel tile: a multiple of 128 that divides C (else all of C).

    Capped at 256; for B == 1 additionally capped at C//2 so the pool grid has
    >= 2 parallel units (keeps both v7x TensorCores busy).
    """
    if C % 128 != 0:
        return C
    cap = 256
    if B < 2:
        cap = min(cap, max(128, C // 2))
    best = 128
    t = 256
    while t <= min(C, cap):
        if C % t == 0:
            best = t
        t += 128
    return best


def _pick_hw_tile(HW, c_tile, itemsize, target_bytes):
    """Lane-dense spatial tile (multiple of 128), sized so one x tile ~= target_bytes."""
    hw_cap = _round_up(HW, 128)
    want = target_bytes // max(1, c_tile * itemsize)
    hw_tile = max(128, (want // 128) * 128)
    return min(hw_tile, hw_cap)


# --------------------------- kernels ---------------------------------------


def _pool_kernel(x_ref, sum_ref, *, hw_true, hw_tile, ragged):
    # x_ref: (1, c_tile, hw_tile) native dtype; sum_ref: (1, c_tile, 1) f32 accumulator.
    @pl.when(pl.program_id(2) == 0)
    def _():
        sum_ref[...] = jnp.zeros_like(sum_ref)

    x = x_ref[...]
    if ragged:
        # Mask lanes past the true spatial extent: Pallas edge-block padding is
        # unspecified, so zero it before the reduction (interior tiles pass the
        # compare trivially; the extra VPU work hides under DMA).
        hi = pl.program_id(2)
        lane = lax.broadcasted_iota(jnp.int32, x.shape, 2)
        x = jnp.where(hi * hw_tile + lane < hw_true, x, 0)

    # f32 accumulation without materializing an f32 copy of the slab.
    sum_ref[...] += jnp.sum(x, axis=-1, keepdims=True, dtype=jnp.float32)


def _excite_kernel(p_ref, w1_ref, w2_ref, g_ref, *, inv_hw):
    # p_ref: (B, C) f32 pooled sums; w1: (C, C//r); w2: (C//r, C); g_ref: (B, C) x.dtype.
    # Mean scaling, ReLU, sigmoid and the output cast are all fused here so only a
    # single tiny dispatch sits between the two streaming phases.
    p = p_ref[...] * inv_hw
    h = jnp.maximum(
        jnp.dot(p, w1_ref[...].astype(jnp.float32), preferred_element_type=jnp.float32),
        0.0,
    )
    y = jnp.dot(h, w2_ref[...].astype(jnp.float32), preferred_element_type=jnp.float32)
    g_ref[...] = jax.nn.sigmoid(y).astype(g_ref.dtype)


def _scale_kernel(x_ref, g_ref, o_ref):
    # x_ref/o_ref: (1, c_tile, hw_tile) native dtype; g_ref: (1, c_tile, 1) native dtype.
    # Out-of-range lanes of the ragged last block are dropped on writeback by Pallas.
    o_ref[...] = x_ref[...] * g_ref[...]


# --------------------------- wrapper ----------------------------------------


def se_layer(x_nchw, w1, w2, *, block_bytes=2 << 20, donate_x=False):
    """SELayer forward. x_nchw: (B, C, H, W); w1: (C, C//r); w2: (C//r, C).

    Set donate_x=True only if the caller does not need x afterwards (aliases x's
    HBM buffer with the output, halving peak activation footprint).
    """
    B, C, H, W = x_nchw.shape
    HW = H * W
    itemsize = jnp.dtype(x_nchw.dtype).itemsize

    c_tile = _pick_c_tile(C, B)
    hw_tile = _pick_hw_tile(HW, c_tile, itemsize, block_bytes)
    n_c = C // c_tile
    n_hw = pl.cdiv(HW, hw_tile)
    ragged = (HW % hw_tile) != 0

    x3 = x_nchw.reshape(B, C, HW)  # no padding, no copy of the slab

    # ---- phase 1: pooled f32 sums over the spatial axis ----------------------
    sums = pl.pallas_call(
        functools.partial(_pool_kernel, hw_true=HW, hw_tile=hw_tile, ragged=ragged),
        out_shape=jax.ShapeDtypeStruct((B, C, 1), jnp.float32),
        grid=(B, n_c, n_hw),
        in_specs=[pl.BlockSpec((1, c_tile, hw_tile), lambda b, ci, hi: (b, ci, hi))],
        out_specs=pl.BlockSpec((1, c_tile, 1), lambda b, ci, hi: (b, ci, 0)),
        compiler_params=pltpu.CompilerParams(
            dimension_semantics=("parallel", "parallel", "arbitrary")),
    )(x3)

    # ---- phase 2: fused excitation MLP, whole batch at once ------------------
    gate2d = pl.pallas_call(
        functools.partial(_excite_kernel, inv_hw=1.0 / HW),
        out_shape=jax.ShapeDtypeStruct((B, C), x_nchw.dtype),
        in_specs=[pl.BlockSpec(memory_space=pltpu.MemorySpace.VMEM)] * 3,
        out_specs=pl.BlockSpec(memory_space=pltpu.MemorySpace.VMEM),
    )(sums.reshape(B, C), w1, w2)
    gate = gate2d.reshape(B, C, 1)  # tiny (B, C) relayout only

    # ---- phase 3: broadcast scale, fully parallel, lane-dense stores ---------
    out3 = pl.pallas_call(
        _scale_kernel,
        out_shape=jax.ShapeDtypeStruct((B, C, HW), x_nchw.dtype),
        grid=(B, n_c, n_hw),
        in_specs=[
            pl.BlockSpec((1, c_tile, hw_tile), lambda b, ci, hi: (b, ci, hi)),
            pl.BlockSpec((1, c_tile, 1), lambda b, ci, hi: (b, ci, 0)),
        ],
        out_specs=pl.BlockSpec((1, c_tile, hw_tile), lambda b, ci, hi: (b, ci, hi)),
        compiler_params=pltpu.CompilerParams(
            dimension_semantics=("parallel", "parallel", "parallel")),
        input_output_aliases=({0: 0} if donate_x else {}),
    )(x3, gate)

    return out3.reshape(B, C, H, W)


if __name__ == "__main__":
    # Module-consistent small shapes: channel >= reduction so hidden dim > 0.
    B, C, H, W = 2, 32, 16, 16
    reduction = 16
    hidden = C // reduction

    key = jax.random.PRNGKey(0)
    kx, k1, k2 = jax.random.split(key, 3)

    x = jax.random.normal(kx, (B, C, H, W), dtype=jnp.float32)
    # JAX (in, out) convention; PyTorch Linear stores (out, in) and applies
    # x @ W^T — mathematically identical.
    w1 = jax.random.normal(k1, (C, hidden), dtype=jnp.float32) * (1.0 / jnp.sqrt(C))
    w2 = jax.random.normal(k2, (hidden, C), dtype=jnp.float32) * (1.0 / jnp.sqrt(hidden))

    se = jax.jit(se_layer)
    out = se(x, w1, w2)
    jax.block_until_ready(out)

    # Pure-JAX reference check.
    pooled_ref = x.mean(axis=(2, 3))                                 # (B, C)
    gate_ref = jax.nn.sigmoid(jnp.maximum(pooled_ref @ w1, 0.0) @ w2)
    ref = x * gate_ref[:, :, None, None]
    assert jnp.allclose(out, ref, atol=1e-5, rtol=1e-5), "mismatch vs reference"

    print("KERNEL_OK")
</pallas_src>

<mosaic_0001>
module attributes {stable_mosaic.version = 11 : i64} {
  func.func @_pool_kernel(%arg0: i32, %arg1: i32, %arg2: i32, %arg3: memref<1x32x256xf32, #tpu.memory_space<vmem>>, %arg4: memref<1x32x1xf32, #tpu.memory_space<vmem>>) attributes {dimension_semantics = [#tpu.dimension_semantics<parallel>, #tpu.dimension_semantics<parallel>, #tpu.dimension_semantics<arbitrary>], iteration_bounds = array<i64: 2, 1, 1>, scalar_prefetch = 0 : i64, scratch_operands = 0 : i64, tpu.core_type = #tpu.core_type<tc>, window_params = [{transform_indices = @transform_0, window_bounds = array<i64: 1, 32, 256>}, {transform_indices = @transform_1, window_bounds = array<i64: 1, 32, 1>}]} {
    %c0_i32 = arith.constant 0 : i32
    %0 = arith.cmpi eq, %arg2, %c0_i32 : i32
    %1 = arith.extui %0 : i1 to i32
    %c0_i32_0 = arith.constant 0 : i32
    %2 = arith.cmpi ne, %1, %c0_i32_0 : i32
    scf.if %2 {
      %cst_9 = arith.constant 0.000000e+00 : f32
      %9 = vector.broadcast %cst_9 : f32 to vector<1x32x1xf32>
      %c0_10 = arith.constant 0 : index
      %c0_11 = arith.constant 0 : index
      %c0_12 = arith.constant 0 : index
      %10 = vector.load %arg4[%c0_10, %c0_11, %c0_12] : memref<1x32x1xf32, #tpu.memory_space<vmem>>, vector<1x32x1xf32>
      tpu.vector_store %arg4[%c0_10, %c0_11, %c0_12], %9 {strides = array<i32>} : memref<1x32x1xf32, #tpu.memory_space<vmem>>, vector<1x32x1xf32>,
    } else {
    }
    %c0 = arith.constant 0 : index
    %c0_1 = arith.constant 0 : index
    %c0_2 = arith.constant 0 : index
    %3 = vector.load %arg3[%c0, %c0_1, %c0_2] : memref<1x32x256xf32, #tpu.memory_space<vmem>>, vector<1x32x256xf32>
    %c0_3 = arith.constant 0 : index
    %c0_4 = arith.constant 0 : index
    %c0_5 = arith.constant 0 : index
    %4 = vector.load %arg4[%c0_3, %c0_4, %c0_5] : memref<1x32x1xf32, #tpu.memory_space<vmem>>, vector<1x32x1xf32>
    %cst = arith.constant dense<0.000000e+00> : vector<1x32xf32>
    %5 = vector.multi_reduction <add>, %3, %cst [2] : vector<1x32x256xf32> to vector<1x32xf32>
    %6 = vector.shape_cast %5 : vector<1x32xf32> to vector<1x32x1xf32>
    %7 = arith.addf %4, %6 : vector<1x32x1xf32>
    %c0_6 = arith.constant 0 : index
    %c0_7 = arith.constant 0 : index
    %c0_8 = arith.constant 0 : index
    %8 = vector.load %arg4[%c0_6, %c0_7, %c0_8] : memref<1x32x1xf32, #tpu.memory_space<vmem>>, vector<1x32x1xf32>
    tpu.vector_store %arg4[%c0_6, %c0_7, %c0_8], %7 {strides = array<i32>} : memref<1x32x1xf32, #tpu.memory_space<vmem>>, vector<1x32x1xf32>,
    return
  }
  func.func @transform_0(%arg0: i32, %arg1: i32, %arg2: i32) -> (i32, i32, i32) {
    %c0_i32 = arith.constant 0 : i32
    return %arg0, %arg1, %arg2 : i32, i32, i32
  }
  func.func @transform_1(%arg0: i32, %arg1: i32, %arg2: i32) -> (i32, i32, i32) {
    %c0_i32 = arith.constant 0 : i32
    %c0_i32_0 = arith.constant 0 : i32
    return %arg0, %arg1, %c0_i32 : i32, i32, i32
  }
}

module attributes {stable_mosaic.version = 11 : i64} {
  func.func @_excite_kernel(%arg0: memref<2x32xf32, #tpu.memory_space<vmem>>, %arg1: memref<32x2xf32, #tpu.memory_space<vmem>>, %arg2: memref<2x32xf32, #tpu.memory_space<vmem>>, %arg3: memref<2x32xf32, #tpu.memory_space<vmem>>) attributes {dimension_semantics = [], scalar_prefetch = 0 : i64, scratch_operands = 0 : i64, tpu.core_type = #tpu.core_type<tc>} {
    %c0 = arith.constant 0 : index
    %c0_0 = arith.constant 0 : index
    %0 = vector.load %arg0[%c0, %c0_0] : memref<2x32xf32, #tpu.memory_space<vmem>>, vector<2x32xf32>
    %cst = arith.constant 3.906250e-03 : f32
    %1 = vector.broadcast %cst : f32 to vector<2x32xf32>
    %2 = arith.mulf %0, %1 : vector<2x32xf32>
    %c0_1 = arith.constant 0 : index
    %c0_2 = arith.constant 0 : index
    %3 = vector.load %arg1[%c0_1, %c0_2] : memref<32x2xf32, #tpu.memory_space<vmem>>, vector<32x2xf32>
    %cst_3 = arith.constant dense<0.000000e+00> : vector<2x2xf32>
    %4 = tpu.matmul %2, %3, %cst_3 {dimension_numbers = #tpu.dot_dimension_numbers<[1], [0], [0], [1], [0, 0, 1, 1], [], []>} : vector<2x32xf32>, vector<32x2xf32>, vector<2x2xf32> -> vector<2x2xf32>
    %cst_4 = arith.constant 0.000000e+00 : f32
    %5 = vector.broadcast %cst_4 : f32 to vector<2x2xf32>
    %6 = arith.maximumf %4, %5 : vector<2x2xf32>
    %c0_5 = arith.constant 0 : index
    %c0_6 = arith.constant 0 : index
    %7 = vector.load %arg2[%c0_5, %c0_6] : memref<2x32xf32, #tpu.memory_space<vmem>>, vector<2x32xf32>
    %cst_7 = arith.constant dense<0.000000e+00> : vector<2x32xf32>
    %8 = tpu.matmul %6, %7, %cst_7 {dimension_numbers = #tpu.dot_dimension_numbers<[1], [0], [0], [1], [0, 0, 1, 1], [], []>} : vector<2x2xf32>, vector<2x32xf32>, vector<2x32xf32> -> vector<2x32xf32>
    %9 = arith.negf %8 : vector<2x32xf32>
    %10 = math.exp %9 : vector<2x32xf32>
    %cst_8 = arith.constant 1.000000e+00 : f32
    %11 = vector.broadcast %cst_8 : f32 to vector<2x32xf32>
    %12 = arith.addf %11, %10 : vector<2x32xf32>
    %13 = arith.divf %11, %12 : vector<2x32xf32>
    %c0_9 = arith.constant 0 : index
    %c0_10 = arith.constant 0 : index
    %14 = vector.load %arg3[%c0_9, %c0_10] : memref<2x32xf32, #tpu.memory_space<vmem>>, vector<2x32xf32>
    tpu.vector_store %arg3[%c0_9, %c0_10], %13 {strides = array<i32>} : memref<2x32xf32, #tpu.memory_space<vmem>>, vector<2x32xf32>,
    return
  }
}

module attributes {stable_mosaic.version = 11 : i64} {
  func.func @_scale_kernel(%arg0: i32, %arg1: i32, %arg2: i32, %arg3: memref<1x32x256xf32, #tpu.memory_space<vmem>>, %arg4: memref<1x32x1xf32, #tpu.memory_space<vmem>>, %arg5: memref<1x32x256xf32, #tpu.memory_space<vmem>>) attributes {dimension_semantics = [#tpu.dimension_semantics<parallel>, #tpu.dimension_semantics<parallel>, #tpu.dimension_semantics<parallel>], iteration_bounds = array<i64: 2, 1, 1>, scalar_prefetch = 0 : i64, scratch_operands = 0 : i64, tpu.core_type = #tpu.core_type<tc>, window_params = [{transform_indices = @transform_0, window_bounds = array<i64: 1, 32, 256>}, {transform_indices = @transform_1, window_bounds = array<i64: 1, 32, 1>}, {transform_indices = @transform_2, window_bounds = array<i64: 1, 32, 256>}]} {
    %c0 = arith.constant 0 : index
    %c0_0 = arith.constant 0 : index
    %c0_1 = arith.constant 0 : index
    %0 = vector.load %arg3[%c0, %c0_0, %c0_1] : memref<1x32x256xf32, #tpu.memory_space<vmem>>, vector<1x32x256xf32>
    %c0_2 = arith.constant 0 : index
    %c0_3 = arith.constant 0 : index
    %c0_4 = arith.constant 0 : index
    %1 = vector.load %arg4[%c0_2, %c0_3, %c0_4] : memref<1x32x1xf32, #tpu.memory_space<vmem>>, vector<1x32x1xf32>
    %2 = vector.broadcast %1 : vector<1x32x1xf32> to vector<1x32x256xf32>
    %3 = arith.mulf %0, %2 : vector<1x32x256xf32>
    %c0_5 = arith.constant 0 : index
    %c0_6 = arith.constant 0 : index
    %c0_7 = arith.constant 0 : index
    %4 = vector.load %arg5[%c0_5, %c0_6, %c0_7] : memref<1x32x256xf32, #tpu.memory_space<vmem>>, vector<1x32x256xf32>
    tpu.vector_store %arg5[%c0_5, %c0_6, %c0_7], %3 {strides = array<i32>} : memref<1x32x256xf32, #tpu.memory_space<vmem>>, vector<1x32x256xf32>,
    return
  }
  func.func @transform_0(%arg0: i32, %arg1: i32, %arg2: i32) -> (i32, i32, i32) {
    %c0_i32 = arith.constant 0 : i32
    return %arg0, %arg1, %arg2 : i32, i32, i32
  }
  func.func @transform_1(%arg0: i32, %arg1: i32, %arg2: i32) -> (i32, i32, i32) {
    %c0_i32 = arith.constant 0 : i32
    %c0_i32_0 = arith.constant 0 : i32
    return %arg0, %arg1, %c0_i32 : i32, i32, i32
  }
  func.func @transform_2(%arg0: i32, %arg1: i32, %arg2: i32) -> (i32, i32, i32) {
    %c0_i32 = arith.constant 0 : i32
    return %arg0, %arg1, %arg2 : i32, i32, i32
  }
}

</mosaic_0001>

<bundles_post_ra>
// kernel: se_layer.4
= control target key start
LH: loop header
LB: loop body
LE: loop exit
PB: predicated region body
PF: predicated region fallthrough
CT: control target
= control target key end

     0   :  { %vm20_vm0 = vcmask 261120   ;;  %vm50_vm1 = vcmask 1041408   ;;  %vm46_vm2 = vcmask 15360   ;;  %vm93_vm6 = vcmask 254976   ;;  %s148_s1 = inlined_call_operand.vmem [shape: f32[32,2], index: 1, kind: input, shape index: {}]   ;;  %s149_s0 = inlined_call_operand.vmem [shape: f32[2,32], index: 0, kind: input, shape index: {}]   ;;  %s150_s2 = inlined_call_operand.vmem [shape: f32[2,32], index: 2, kind: input, shape index: {}]   ;;  %s151_s3 = inlined_call_operand.vmem [shape: f32[2,32], index: 3, kind: output, shape index: {}]  }
   0x1   :  { %v19_v0 = vld [vmem:[%s148_s1 + $0x18] sm:$0xff]  ;;  %v18_v1 = vld [vmem:[%s148_s1 + $0x10] sm:$0xff]  ;;  %v14_v2 = vld [vmem:[%s149_s0] sm:$0x3] }
   0x2   :  { %36 = vmatpush.msra.mxu0 %v19_v0  ;;  %v17_v3 = vld [vmem:[%s148_s1 + $0x8] sm:$0xff]  ;;  %v16_v4 = vld [vmem:[%s148_s1] sm:$0xff]  ;;  %v15_v5 = vmul.f32 0.00390625, %v14_v2 }
   0x3   :  { %v45_v6 = vld [vmem:[%s150_s2] sm:$0x3] }
   0x4   :  { %37 = vmatpush.msra.mxu0 %v18_v1  ;;  %100 = vmatpush.msk.msra.mxu1 %vm50_vm1, %v45_v6 }
   0x6   :  { %38 = vmatpush.msra.mxu0 %v17_v3 }
   0x8   :  { %39 = vmatpush.msra.mxu0 %v16_v4 }
   0x9   :  { %99 = vmatmul.msk.f32.vlgmr.msra.gmra.mxu0 %vm20_vm0, %v15_v5 }
  0x86   :  { %v41_v7 = vpop.f32.mrf.mxu0 }
  0x87   :  { %v44_v8 = vmax.f32 %v41_v7, 0.0 }
  0x89   :  { %101 = vmatmul.msk.f32.vlgmr.msra.gmra.mxu1 %vm46_vm2, %v44_v8 }
 0x106   :  { %v71_v9 = vpop.f32.mrf.mxu1 }
 0x107   :  { %v102_v10 = vmul.f32 -1.442695, %v71_v9 }
 0x109   :  { %103 = vpow2.f32 %v102_v10 }
 0x10f   :  { %v104_v11 = vpop.eup %103 }
 0x110   :  { %v77_v12 = vadd.f32 1.0, %v104_v11 }
 0x112   :  { %105 = vrcp.f32 %v77_v12  ;;  %v89_v16 = vand.u32 2147483648, %v77_v12  ;;  %v87_v18 = vand.u32 2147483647, %v77_v12  ;;  %vm83_vm4 = vweird.f32 %v77_v12 }
 0x114   :  { %v90_v20 = vor.u32 1.1754944e-38, %v89_v16  ;;  %vm88_vm7 = vcmp.eq.f32.partialorder %v87_v18, 8.507059e+37 }
 0x118   :  { %v106_v13 = vpop.eup %105 }
 0x119   :  { %v79_v14 = vmul.f32 %v106_v13, %v77_v12  ;;  %vm84_vm3 = vweird.f32 %v106_v13 }
 0x11a   :  { %vm85_vm5 = vmor %vm83_vm4, %vm84_vm3 }
 0x11b   :  { %v80_v15 = vsub.f32 1.0, %v79_v14 }
 0x11d   :  { %v81_v17 = vmul.f32 %v106_v13, %v80_v15 }
 0x11f   :  { %v82_v19 = vadd.f32 %v106_v13, %v81_v17 }
 0x121   :  { %v86_v21 = vsel %vm85_vm5, %v106_v13, %v82_v19 }
 0x122   :  { %v91_v22 = vsel %vm88_vm7, %v90_v20, %v86_v21 }
 0x123   :  { %94 = vst.msk [vmem:[%s151_s3] sm:$0x3] %vm93_vm6, %v91_v22 }

// kernel: se_layer.3
= control target key start
LH: loop header
LB: loop body
LE: loop exit
PB: predicated region body
PF: predicated region fallthrough
CT: control target
= control target key end

     0   :  { %s393_s6 = smov 0   ;;  %s395_s7 = smov 0   ;;  %s448_s0 = inlined_call_operand.vmem [shape: f32[2,32,256], index: 0, kind: input, shape index: {}]   ;;  %s449_s1 = inlined_call_operand.vmem [shape: f32[2,32,1], index: 1, kind: output, shape index: {}]  }
   0x1   :  { %s397_s8 = smov 0  }
   0x2 LB: > { %s30_s9 = sadd.s32 1, %s376_s7  ;;  %p324_p0 = scmp.ge.s32.totalorder %s380_s8, 1  ;;  %s380_s8 = sphi %s397_s8, %s11_s8   ;;  %s376_s7 = sphi %s395_s7, %s451_s7   ;;  %s372_s6 = sphi %s393_s6, %s450_s6  }
   0x3   : > { %p32_p1 = scmp.ge.s32.totalorder %s30_s9, 2  ;;  %p123_p2 = scmp.lt.s32.totalorder %s380_s8, 3 }
   0x5   : > { %s453_s9 = smov (%p32_p1, %s30_s9), 0  ;;  %p124_p3 = pnand %p324_p0, %p123_p2 }
   0x6   : > { %p158_p4 = scmp.lt.s32.totalorder (!%p124_p3), %s372_s6, 1 }
   0x7   : > { %127 = sbr.rel (%p124_p3) target bundleno = 146 (0x92), region = 24 }
   0xc   : > { %s455_s6 = smov (!%p158_p4, %s372_s6), 1  ;;  %vm186_vm0 = vcmask 7168   ;;  %v382_v3 = vmov 0.0  }
   0xd   : > { %s331_s10 = sshll.u32 %s455_s6, 6  ;;  %s332_s11 = sshll.u32 %s455_s6, 5 }
   0xe   : > { %s169_s14 = scalar_lea.vmem %s448_s0, %s331_s10  ;;  %s417_s17 = scalar_lea.vmem %s449_s1, %s332_s11 }
   0xf   : > { %v195_v0 = vld [vmem:[%s169_s14 + $0x20] sm:$0xff]  ;;  %v196_v1 = vld [vmem:[%s169_s14 + $0x28] sm:$0xff]  ;;  %189 = vst.msk [vmem:[%s417_s17 + $0x10] sm:$0xff] %vm186_vm0, %v382_v3  ;;  %v197_v7 = vld [vmem:[%s169_s14 + $0x30] sm:$0xff] }
  0x10   : > { %v191_v2 = vld [vmem:[%s169_s14] sm:$0xff]  ;;  %v209_v4 = vadd.f32 %v196_v1, %v195_v0  ;;  %v192_v5 = vld [vmem:[%s169_s14 + $0x8] sm:$0xff]  ;;  %187 = vst.msk [vmem:[%s417_s17] sm:$0xff] %vm186_vm0, %v382_v3  ;;  %v198_v8 = vld [vmem:[%s169_s14 + $0x38] sm:$0xff] }
  0x11   : > { %v203_v6 = vadd.f32 %v192_v5, %v191_v2  ;;  %188 = vst.msk [vmem:[%s417_s17 + $0x8] sm:$0xff] %vm186_vm0, %v382_v3  ;;  %v193_v9 = vld [vmem:[%s169_s14 + $0x10] sm:$0xff]  ;;  %v194_v10 = vld [vmem:[%s169_s14 + $0x18] sm:$0xff]  ;;  %v212_v11 = vadd.f32 %v198_v8, %v197_v7 }
  0x12   : > { %210 = vadd.xlane.f32.xlu1 %v209_v4  ;;  %190 = vst.msk [vmem:[%s417_s17 + $0x18] sm:$0xff] %vm186_vm0, %v382_v3  ;;  %v206_v12 = vadd.f32 %v194_v10, %v193_v9 }
  0x13   : > { %204 = vadd.xlane.f32.xlu0 %v203_v6 }
  0x16   : > { %v201_v13 = vld [vmem:[%s417_s17 + $0x10] sm:$0xff] }
  0x17   : > { %v199_v14 = vld [vmem:[%s417_s17] sm:$0xff] }
  0x18   : > { %v200_v20 = vld [vmem:[%s417_s17 + $0x8] sm:$0xff] }
  0x19   : > { %v202_v19 = vld [vmem:[%s417_s17 + $0x18] sm:$0xff] }
  0x1a   : > { %213 = vadd.xlane.f32.xlu1 %v212_v11 }
  0x1b   : > { %207 = vadd.xlane.f32.xlu0 %v206_v12 }
  0x85   : > { %v211_v15 = vpop.xlane.xlu1 %210 }
  0x86   : > { %v217_v16 = vadd.f32 %v211_v15, %v201_v13  ;;  %v205_v17 = vpop.xlane.xlu0 %204 }
  0x87   : > { %v215_v18 = vadd.f32 %v205_v17, %v199_v14 }
  0x88   : > { %222 = vst.msk [vmem:[%s417_s17 + $0x10] sm:$0xff] %vm186_vm0, %v217_v16 }
  0x89   : > { %220 = vst.msk [vmem:[%s417_s17] sm:$0xff] %vm186_vm0, %v215_v18 }
  0x8d   : > { %v214_v21 = vpop.xlane.xlu1 %213 }
  0x8e   : > { %v218_v22 = vadd.f32 %v214_v21, %v202_v19  ;;  %v208_v23 = vpop.xlane.xlu0 %207 }
  0x8f   : > { %v216_v24 = vadd.f32 %v208_v23, %v200_v20 }
  0x90   : > { %223 = vst.msk [vmem:[%s417_s17 + $0x18] sm:$0xff] %vm186_vm0, %v218_v22 }
  0x91   : > { %221 = vst.msk [vmem:[%s417_s17 + $0x8] sm:$0xff] %vm186_vm0, %v216_v24 }
  0x92 PF: > { %s11_s8 = sadd.s32 1, %s380_s8   ;;  %s450_s6 = smov %s376_s7 }
  0x93   : > { %p8_p5 = scmp.ge.s32.totalorder %s11_s8, 4   ;;  %s451_s7 = smov %s453_s9 }
  0x95   :  { %10 = sbr.rel (!%p8_p5) target bundleno = 2 (0x2), region = 58 }

// kernel: se_layer.5
= control target key start
LH: loop header
LB: loop body
LE: loop exit
PB: predicated region body
PF: predicated region fallthrough
CT: control target
= control target key end

     0   :  { %s522_s9 = smov 0   ;;  %s524_s10 = smov 0   ;;  %s558_s0 = inlined_call_operand.vmem [shape: f32[2,32,256], index: 0, kind: input, shape index: {}]   ;;  %s559_s1 = inlined_call_operand.vmem [shape: f32[2,32,1], index: 1, kind: input, shape index: {}]   ;;  %s560_s2 = inlined_call_operand.vmem [shape: f32[2,32,256], index: 2, kind: output, shape index: {}]  }
   0x1   :  { %s526_s11 = smov 0  }
   0x2 LB: > { %s31_s12 = sadd.s32 1, %s500_s10  ;;  %p443_p0 = scmp.ge.s32.totalorder %s504_s11, 1  ;;  %s504_s11 = sphi %s526_s11, %s12_s11   ;;  %s500_s10 = sphi %s524_s10, %s562_s10   ;;  %s496_s9 = sphi %s522_s9, %s561_s9  }
   0x3   : > { %p33_p1 = scmp.ge.s32.totalorder %s31_s12, 2  ;;  %p167_p2 = scmp.lt.s32.totalorder %s504_s11, 3 }
   0x5   : > { %s564_s12 = smov (%p33_p1, %s31_s12), 0  ;;  %p168_p3 = pnand %p443_p0, %p167_p2 }
   0x6   : > { %p218_p4 = scmp.lt.s32.totalorder (!%p168_p3), %s496_s9, 1 }
   0x7   : > { %171 = sbr.rel (%p168_p3) target bundleno = 145 (0x91), region = 28 }
   0xc   : > { %v506_v0 = vmov 0   ;;  %s566_s9 = smov (!%p218_p4, %s496_s9), 1 }
   0xd   : > { %481 = vset.pattern.permute.xlu1 %v506_v0  ;;  %480 = vset.pattern.permute.xlu0 %v506_v0  ;;  %s453_s13 = sshll.u32 %s566_s9, 5  ;;  %s452_s17 = sshll.u32 %s566_s9, 6 }
   0xe   : > { %s240_s16 = scalar_lea.vmem %s559_s1, %s453_s13  ;;  %s229_s20 = scalar_lea.vmem %s558_s0, %s452_s17 }
   0xf   : > { %v268_v1 = vld [vmem:[%s240_s16 + $0x10] sm:$0xff]  ;;  %v266_v2 = vld [vmem:[%s240_s16] sm:$0xff]  ;;  %v269_v3 = vld [vmem:[%s240_s16 + $0x18] sm:$0xff]  ;;  %s255_s23 = scalar_lea.vmem %s560_s2, %s452_s17 }
  0x10   : > { %282 = vperm.xlu1 %481, %v268_v1   ;;  %272 = vperm.xlu0 %480, %v266_v2   ;;  %v267_v4 = vld [vmem:[%s240_s16 + $0x8] sm:$0xff]  ;;  %v262_v5 = vld [vmem:[%s229_s20 + $0x20] sm:$0xff]  ;;  %v264_v15 = vld [vmem:[%s229_s20 + $0x30] sm:$0xff] }
  0x11   : > { %v263_v6 = vld [vmem:[%s229_s20 + $0x28] sm:$0xff]  ;;  %v258_v7 = vld [vmem:[%s229_s20] sm:$0xff]  ;;  %v265_v16 = vld [vmem:[%s229_s20 + $0x38] sm:$0xff] }
  0x12   : > { %v259_v8 = vld [vmem:[%s229_s20 + $0x8] sm:$0xff]  ;;  %v260_v17 = vld [vmem:[%s229_s20 + $0x10] sm:$0xff]  ;;  %v261_v18 = vld [vmem:[%s229_s20 + $0x18] sm:$0xff] }
  0x18   : > { %287 = vperm.xlu1 %481, %v269_v3   ;;  %277 = vperm.xlu0 %480, %v267_v4  }
  0x82   : > { %v283_v9 = vpop.permute.xlu1 %282  ;;  %v273_v10 = vpop.permute.xlu0 %272 }
  0x83   : > { %v294_v11 = vmul.f32 %v283_v9, %v262_v5  ;;  %v295_v12 = vmul.f32 %v283_v9, %v263_v6  ;;  %v290_v13 = vmul.f32 %v273_v10, %v258_v7  ;;  %v291_v14 = vmul.f32 %v273_v10, %v259_v8 }
  0x85   : > { %302 = vst [vmem:[%s255_s23 + $0x20] sm:$0xff] %v294_v11 }
  0x86   : > { %303 = vst [vmem:[%s255_s23 + $0x28] sm:$0xff] %v295_v12 }
  0x87   : > { %298 = vst [vmem:[%s255_s23] sm:$0xff] %v290_v13 }
  0x88   : > { %299 = vst [vmem:[%s255_s23 + $0x8] sm:$0xff] %v291_v14 }
  0x8a   : > { %v288_v19 = vpop.permute.xlu1 %287  ;;  %v278_v20 = vpop.permute.xlu0 %277 }
  0x8b   : > { %v296_v21 = vmul.f32 %v288_v19, %v264_v15  ;;  %v297_v22 = vmul.f32 %v288_v19, %v265_v16  ;;  %v292_v23 = vmul.f32 %v278_v20, %v260_v17  ;;  %v293_v24 = vmul.f32 %v278_v20, %v261_v18 }
  0x8d   : > { %304 = vst [vmem:[%s255_s23 + $0x30] sm:$0xff] %v296_v21 }
  0x8e   : > { %305 = vst [vmem:[%s255_s23 + $0x38] sm:$0xff] %v297_v22 }
  0x8f   : > { %300 = vst [vmem:[%s255_s23 + $0x10] sm:$0xff] %v292_v23 }
  0x90   : > { %301 = vst [vmem:[%s255_s23 + $0x18] sm:$0xff] %v293_v24 }
  0x91 PF: > { %s12_s11 = sadd.s32 1, %s504_s11   ;;  %s561_s9 = smov %s500_s10 }
  0x92   : > { %p9_p5 = scmp.ge.s32.totalorder %s12_s11, 4   ;;  %s562_s10 = smov %s564_s12 }
  0x94   :  { %11 = sbr.rel (!%p9_p5) target bundleno = 2 (0x2), region = 61 }

</bundles_post_ra>
